<compile_context>
chip_gen: v7x
topology: tpu7x:2x2x1
jax: 0.10.0
libtpu: 0.0.40
codegen_flags: <defaults>
</compile_context>

<pallas_src>
import math

import jax
import jax.numpy as jnp
from jax.experimental import pallas as pl
from jax.experimental.pallas import tpu as pltpu

_LANE = 128      # vreg lane width (last dim)
_SUBLANE = 8     # vreg sublane width (second-to-last dim)


def _round_up(x, m):
    return ((x + m - 1) // m) * m


def _actor_forward_kernel(x_ref, w1_ref, b1_ref, w2_ref, b2_ref, o_ref):
    """Fused: out = tanh( tanh(x @ W1 + b1) @ W2 + b2 ) for one batch tile.

    x/W1/W2 arrive already cast to the matmul dtype (f32 or bf16); both dots
    accumulate in f32 on the MXU; biases, bias-add and tanh stay in f32 on the
    VPU/EUP (v5e has no bf16 VPU/EUP).
    """
    x = x_ref[...]                                           # (TB, Sp)
    w1 = w1_ref[...]                                         # (Sp, Wp)
    h = jnp.dot(x, w1, preferred_element_type=jnp.float32)   # f32 (TB, Wp)
    h = jnp.tanh(h + b1_ref[...])                            # f32, (1,Wp) bcast

    w2 = w2_ref[...]                                         # (Wp, Wp)
    o = jnp.dot(h.astype(w2.dtype), w2,
                preferred_element_type=jnp.float32)          # f32 (TB, Wp)
    o = jnp.tanh(o + b2_ref[...])
    o_ref[...] = o.astype(o_ref.dtype)


def actor_forward(state, w1, b1, w2, b2, *, block_batch=None,
                  matmul_dtype=jnp.float32):
    """Pallas wrapper.

    state: (batch, state_dim) f32
    w1:    (state_dim, net_width)   b1: (1, net_width)
    w2:    (net_width, net_width)   b2: (1, net_width)
    Returns (batch, net_width) f32, identical to tanh(tanh(x@W1+b1)@W2+b2).
    """
    batch, state_dim = state.shape
    net_width = w1.shape[1]
    assert w1.shape[0] == state_dim
    assert w2.shape == (net_width, net_width)

    # Lane-pad feature dims; sublane-pad / tile the batch dim.
    sp = _round_up(state_dim, _LANE)
    wp = _round_up(net_width, _LANE)
    if block_batch is None:
        block_batch = min(512, _round_up(batch, _SUBLANE))
    block_batch = _round_up(block_batch, _SUBLANE)
    bp = _round_up(batch, block_batch)
    grid = (bp // block_batch,)

    mdt = jnp.dtype(matmul_dtype)

    # Zero-padding keeps padded columns inert (tanh(0)=0 feeds zero weights).
    x_p = jnp.zeros((bp, sp), mdt).at[:batch, :state_dim].set(
        state.astype(mdt))
    w1_p = jnp.zeros((sp, wp), mdt).at[:state_dim, :net_width].set(
        w1.astype(mdt))
    w2_p = jnp.zeros((wp, wp), mdt).at[:net_width, :net_width].set(
        w2.astype(mdt))
    b1_p = jnp.zeros((1, wp), jnp.float32).at[:, :net_width].set(
        b1.astype(jnp.float32).reshape(1, net_width))
    b2_p = jnp.zeros((1, wp), jnp.float32).at[:, :net_width].set(
        b2.astype(jnp.float32).reshape(1, net_width))

    cost = pl.CostEstimate(
        flops=int(2 * bp * sp * wp + 2 * bp * wp * wp),
        transcendentals=int(2 * bp * wp),
        bytes_accessed=int((bp * sp + sp * wp + wp * wp) * mdt.itemsize
                           + 2 * wp * 4 + bp * wp * 4),
    )

    out_padded = pl.pallas_call(
        _actor_forward_kernel,
        out_shape=jax.ShapeDtypeStruct((bp, wp), jnp.float32),
        grid=grid,
        in_specs=[
            pl.BlockSpec((block_batch, sp), lambda i: (i, 0)),  # x tile
            pl.BlockSpec((sp, wp), lambda i: (0, 0)),           # W1 resident
            pl.BlockSpec((1, wp), lambda i: (0, 0)),            # b1 resident
            pl.BlockSpec((wp, wp), lambda i: (0, 0)),           # W2 resident
            pl.BlockSpec((1, wp), lambda i: (0, 0)),            # b2 resident
        ],
        out_specs=pl.BlockSpec((block_batch, wp), lambda i: (i, 0)),
        compiler_params=pltpu.CompilerParams(
            dimension_semantics=("parallel",),   # shard batch tiles on v7x TCs
        ),
        cost_estimate=cost,
    )(x_p, w1_p, b1_p, w2_p, b2_p)

    return out_padded[:batch, :net_width]


def init_linear_params(key, fan_in, fan_out):
    """PyTorch nn.Linear default init: U(-1/sqrt(fan_in), 1/sqrt(fan_in)).
    Weight returned as (fan_in, fan_out) so the kernel computes x @ W + b."""
    kw, kb = jax.random.split(key)
    bound = 1.0 / math.sqrt(fan_in)
    w = jax.random.uniform(kw, (fan_in, fan_out), jnp.float32, -bound, bound)
    b = jax.random.uniform(kb, (1, fan_out), jnp.float32, -bound, bound)
    return w, b


if __name__ == "__main__":
    # Small shapes consistent with the module's forward().
    batch = 8
    state_dim = 16
    net_width = 32
    action_dim = 4   # only needed by l3 / pi(), which forward() never touches

    key = jax.random.PRNGKey(0)
    k_x, k_l1, k_l2, k_l3 = jax.random.split(key, 4)

    state = jax.random.normal(k_x, (batch, state_dim), jnp.float32)
    w1, b1 = init_linear_params(k_l1, state_dim, net_width)
    w2, b2 = init_linear_params(k_l2, net_width, net_width)
    # TODO(synk): l3 (net_width -> action_dim) + softmax belong to Actor.pi(),
    # not forward(); parameters initialized only for shape completeness.
    w3, b3 = init_linear_params(k_l3, net_width, action_dim)

    ref = jnp.tanh(jnp.tanh(state @ w1 + b1) @ w2 + b2)

    # f32 MXU path (exact match with the reference).
    out = jax.block_until_ready(actor_forward(state, w1, b1, w2, b2))
    assert out.shape == (batch, net_width)
    assert jnp.allclose(out, ref, atol=1e-5, rtol=1e-5), "f32 mismatch vs ref"

    # bf16 MXU path (v6e/v7x throughput); f32 accumulation -> relaxed tol.
    out_bf16 = jax.block_until_ready(
        actor_forward(state, w1, b1, w2, b2, matmul_dtype=jnp.bfloat16))
    assert jnp.allclose(out_bf16, ref, atol=3e-2, rtol=3e-2), "bf16 mismatch"

    # Larger, non-aligned batch to exercise the batch-tiled 'parallel' grid
    # and batch padding (3 grid steps of 128 rows).
    big_batch = 300
    state_big = jax.random.normal(jax.random.PRNGKey(1),
                                  (big_batch, state_dim), jnp.float32)
    ref_big = jnp.tanh(jnp.tanh(state_big @ w1 + b1) @ w2 + b2)
    out_big = jax.block_until_ready(
        actor_forward(state_big, w1, b1, w2, b2, block_batch=128))
    assert out_big.shape == (big_batch, net_width)
    assert jnp.allclose(out_big, ref_big, atol=1e-5, rtol=1e-5), \
        "tiled-batch mismatch vs ref"

    print("KERNEL_OK")
</pallas_src>

<mosaic_0001>
module attributes {stable_mosaic.version = 11 : i64} {
  func.func @_actor_forward_kernel(%arg0: i32, %arg1: memref<8x128xf32, #tpu.memory_space<vmem>>, %arg2: memref<128x128xf32, #tpu.memory_space<vmem>>, %arg3: memref<1x128xf32, #tpu.memory_space<vmem>>, %arg4: memref<128x128xf32, #tpu.memory_space<vmem>>, %arg5: memref<1x128xf32, #tpu.memory_space<vmem>>, %arg6: memref<8x128xf32, #tpu.memory_space<vmem>>) attributes {dimension_semantics = [#tpu.dimension_semantics<parallel>], iteration_bounds = array<i64: 1>, scalar_prefetch = 0 : i64, scratch_operands = 0 : i64, tpu.core_type = #tpu.core_type<tc>, window_params = [{transform_indices = @transform_0, window_bounds = array<i64: 8, 128>}, {pipeline_mode = #tpu.pipeline_mode<synchronous>, transform_indices = @transform_1, window_bounds = array<i64: 128, 128>}, {pipeline_mode = #tpu.pipeline_mode<synchronous>, transform_indices = @transform_2, window_bounds = array<i64: 1, 128>}, {pipeline_mode = #tpu.pipeline_mode<synchronous>, transform_indices = @transform_3, window_bounds = array<i64: 128, 128>}, {pipeline_mode = #tpu.pipeline_mode<synchronous>, transform_indices = @transform_4, window_bounds = array<i64: 1, 128>}, {transform_indices = @transform_5, window_bounds = array<i64: 8, 128>}]} {
    %c0 = arith.constant 0 : index
    %c0_0 = arith.constant 0 : index
    %0 = vector.load %arg1[%c0, %c0_0] : memref<8x128xf32, #tpu.memory_space<vmem>>, vector<8x128xf32>
    %c0_1 = arith.constant 0 : index
    %c0_2 = arith.constant 0 : index
    %1 = vector.load %arg2[%c0_1, %c0_2] : memref<128x128xf32, #tpu.memory_space<vmem>>, vector<128x128xf32>
    %cst = arith.constant dense<0.000000e+00> : vector<8x128xf32>
    %2 = tpu.matmul %0, %1, %cst {dimension_numbers = #tpu.dot_dimension_numbers<[1], [0], [0], [1], [0, 0, 1, 1], [], []>} : vector<8x128xf32>, vector<128x128xf32>, vector<8x128xf32> -> vector<8x128xf32>
    %c0_3 = arith.constant 0 : index
    %c0_4 = arith.constant 0 : index
    %3 = vector.load %arg3[%c0_3, %c0_4] : memref<1x128xf32, #tpu.memory_space<vmem>>, vector<1x128xf32>
    %4 = vector.broadcast %3 : vector<1x128xf32> to vector<8x128xf32>
    %5 = arith.addf %2, %4 : vector<8x128xf32>
    %6 = math.tanh %5 : vector<8x128xf32>
    %c0_5 = arith.constant 0 : index
    %c0_6 = arith.constant 0 : index
    %7 = vector.load %arg4[%c0_5, %c0_6] : memref<128x128xf32, #tpu.memory_space<vmem>>, vector<128x128xf32>
    %cst_7 = arith.constant dense<0.000000e+00> : vector<8x128xf32>
    %8 = tpu.matmul %6, %7, %cst_7 {dimension_numbers = #tpu.dot_dimension_numbers<[1], [0], [0], [1], [0, 0, 1, 1], [], []>} : vector<8x128xf32>, vector<128x128xf32>, vector<8x128xf32> -> vector<8x128xf32>
    %c0_8 = arith.constant 0 : index
    %c0_9 = arith.constant 0 : index
    %9 = vector.load %arg5[%c0_8, %c0_9] : memref<1x128xf32, #tpu.memory_space<vmem>>, vector<1x128xf32>
    %10 = vector.broadcast %9 : vector<1x128xf32> to vector<8x128xf32>
    %11 = arith.addf %8, %10 : vector<8x128xf32>
    %12 = math.tanh %11 : vector<8x128xf32>
    %c0_10 = arith.constant 0 : index
    %c0_11 = arith.constant 0 : index
    %13 = vector.load %arg6[%c0_10, %c0_11] : memref<8x128xf32, #tpu.memory_space<vmem>>, vector<8x128xf32>
    tpu.vector_store %arg6[%c0_10, %c0_11], %12 {strides = array<i32>} : memref<8x128xf32, #tpu.memory_space<vmem>>, vector<8x128xf32>,
    return
  }
  func.func @transform_0(%arg0: i32) -> (i32, i32) {
    %c0_i32 = arith.constant 0 : i32
    %c0_i32_0 = arith.constant 0 : i32
    return %arg0, %c0_i32 : i32, i32
  }
  func.func @transform_1(%arg0: i32) -> (i32, i32) {
    %c0_i32 = arith.constant 0 : i32
    %c0_i32_0 = arith.constant 0 : i32
    %c0_i32_1 = arith.constant 0 : i32
    return %c0_i32, %c0_i32_0 : i32, i32
  }
  func.func @transform_2(%arg0: i32) -> (i32, i32) {
    %c0_i32 = arith.constant 0 : i32
    %c0_i32_0 = arith.constant 0 : i32
    %c0_i32_1 = arith.constant 0 : i32
    return %c0_i32, %c0_i32_0 : i32, i32
  }
  func.func @transform_3(%arg0: i32) -> (i32, i32) {
    %c0_i32 = arith.constant 0 : i32
    %c0_i32_0 = arith.constant 0 : i32
    %c0_i32_1 = arith.constant 0 : i32
    return %c0_i32, %c0_i32_0 : i32, i32
  }
  func.func @transform_4(%arg0: i32) -> (i32, i32) {
    %c0_i32 = arith.constant 0 : i32
    %c0_i32_0 = arith.constant 0 : i32
    %c0_i32_1 = arith.constant 0 : i32
    return %c0_i32, %c0_i32_0 : i32, i32
  }
  func.func @transform_5(%arg0: i32) -> (i32, i32) {
    %c0_i32 = arith.constant 0 : i32
    %c0_i32_0 = arith.constant 0 : i32
    return %arg0, %c0_i32 : i32, i32
  }
}

</mosaic_0001>

<bundles_post_ra>
// kernel: tpu_custom_call.1
= control target key start
LH: loop header
LB: loop body
LE: loop exit
PB: predicated region body
PF: predicated region fallthrough
CT: control target
= control target key end

     0   :  { %10 = vsyncpa [#allocation3], 0  ;;  %s642_s0 = inlined_call_operand.hbm [shape: f32[8,128], index: 0, kind: input, shape index: {}]   ;;  %s643_s1 = inlined_call_operand.hbm [shape: f32[128,128], index: 1, kind: input, shape index: {}]   ;;  %s644_s2 = inlined_call_operand.vmem [shape: f32[1,128], index: 2, kind: input, shape index: {}]   ;;  %s645_s3 = inlined_call_operand.hbm [shape: f32[128,128], index: 3, kind: input, shape index: {}]   ;;  %s646_s4 = inlined_call_operand.vmem [shape: f32[1,128], index: 4, kind: input, shape index: {}]   ;;  %s647_s5 = inlined_call_operand.hbm [shape: f32[8,128], index: 5, kind: output, shape index: {}]  }
   0x1   :  { %11 = vsyncpa [#allocation6], 0 }
   0x2   :  { %12 = vsyncpa [#allocation4], 0  ;;  %s527_s18 = smov [#allocation5]   ;;  %s433_s22 = scalar_lea.hbm %s643_s1, 2048 }
   0x3   :  { %s28_s19 = sshll.u32 %s527_s18, 4  ;;  %p434_p0 = scmp.ne.s32.totalorder %s643_s1, %s433_s22  ;;  %s29_s19 = int_to_ptr.vmem [resolvable:$true] %s28_s19 }
   0x4   :  { %p437_p1 = scmp.lt.u32.totalorder %s433_s22, %s643_s1 }
   0x6   :  { %p439_p2 = pnand %p437_p1, %p434_p0 }
   0x8   :  { %442 = shalt.err (!%p439_p2)
}
   0x9   :  { %s443_s27 = scalar_lea.vmem %s29_s19, 2048  ;;  %p448_p4 = scmp.lt.s32.totalorder %s29_s19, %s29_s19 }
   0xa   :  { %p444_p3 = scmp.ne.s32.totalorder %s29_s19, %s443_s27  ;;  %p449_p5 = scmp.lt.s32.totalorder %s443_s27, %s443_s27 }
   0xc   :  { %p450_p6 = por %p449_p5, %p448_p4 }
   0xe   :  { %p451_p7 = pnand %p450_p6, %p444_p3 }
  0x10   :  { %454 = shalt.err (!%p451_p7)
}
  0x11   :  { %s528_s28 = smov 128   ;;  %s529_s29 = smov 8  }
  0x12   :  { %34 = dma.hbm_to_vmem [thread:$0]  %s643_s1, 2048, %s29_s19, [#allocation6], %s528_s28, %s528_s28, %s529_s29  }
  0x13   :  { %s530_s7 = smov [#allocation2]   ;;  %s531_s9 = smov [#allocation7]  }
  0x14   :  { %s19_s8 = sshll.u32 %s530_s7, 4  ;;  %s42_s10 = sshll.u32 %s531_s9, 4  ;;  %s20_s8 = int_to_ptr.vmem [resolvable:$true] %s19_s8  ;;  %s43_s10 = int_to_ptr.vmem [resolvable:$true] %s42_s10 }
  0x15   :  { %s455_s13 = scalar_lea.hbm %s642_s0, 128 }
  0x16   :  { %p456_p8 = scmp.ne.s32.totalorder %s642_s0, %s455_s13  ;;  %p459_p9 = scmp.lt.u32.totalorder %s455_s13, %s642_s0 }
  0x18   :  { %p461_p10 = pnand %p459_p9, %p456_p8 }
  0x1a   :  { %464 = shalt.err (!%p461_p10)
}
  0x1b   :  { %s465_s1 = scalar_lea.vmem %s20_s8, 128  ;;  %p470_p12 = scmp.lt.s32.totalorder %s20_s8, %s20_s8 }
  0x1c   :  { %p466_p11 = scmp.ne.s32.totalorder %s20_s8, %s465_s1  ;;  %p471_p13 = scmp.lt.s32.totalorder %s465_s1, %s465_s1 }
  0x1e   :  { %p472_p0 = por %p471_p13, %p470_p12 }
  0x20   :  { %p473_p1 = pnand %p472_p0, %p466_p11 }
  0x22   :  { %476 = shalt.err (!%p473_p1)
}
  0x23   :  { %22 = dma.hbm_to_vmem [thread:$0]  %s642_s0, 128, %s20_s8, [#allocation3]  }
  0x24   :  { %s477_s22 = scalar_lea.hbm %s645_s3, 2048 }
  0x25   :  { %p478_p2 = scmp.ne.s32.totalorder %s645_s3, %s477_s22  ;;  %p481_p3 = scmp.lt.u32.totalorder %s477_s22, %s645_s3 }
  0x27   :  { %p483_p4 = pnand %p481_p3, %p478_p2 }
  0x29   :  { %486 = shalt.err (!%p483_p4)
}
  0x2a   :  { %s487_s27 = scalar_lea.vmem %s43_s10, 2048  ;;  %p492_p6 = scmp.lt.s32.totalorder %s43_s10, %s43_s10 }
  0x2b   :  { %p488_p5 = scmp.ne.s32.totalorder %s43_s10, %s487_s27  ;;  %p493_p7 = scmp.lt.s32.totalorder %s487_s27, %s487_s27 }
  0x2d   :  { %p494_p8 = por %p493_p7, %p492_p6 }
  0x2f   :  { %p495_p9 = pnand %p494_p8, %p488_p5 }
  0x31   :  { %498 = shalt.err (!%p495_p9)
}
  0x32   :  { %48 = dma.hbm_to_vmem [thread:$0]  %s645_s3, 2048, %s43_s10, [#allocation6], %s528_s28, %s528_s28, %s529_s29  }
  0x33   :  { %521 = dma.done.wait [#allocation3], 128  }
  0x34   :  { %522 = vsyncadd [#allocation3], 4294967168 }
  0x35   :  { %523 = dma.done.wait [#allocation6], 4096  }
  0x36   :  { %524 = vsyncadd [#allocation6], 4294963200  ;;  %v532_v0 = vmov 0.0|0.0   ;;  %vm533_vm0 = vmmov 0   ;;  %v534_v1 = vmov 0.0   ;;  %v61_v2 = vld [vmem:[#allocation5] sm:$0xff] }
  0x37   :  { %372 = vmatprep.subr.bf16.mxu0 %v532_v0  ;;  %334 = vmatprep.mubr.msk.f32.mxu0 %vm533_vm0, %v534_v1  ;;  %v62_v3 = vld [vmem:[#allocation5 + $0x8] sm:$0xff]  ;;  %v63_v4 = vld [vmem:[#allocation5 + $0x10] sm:$0xff]  ;;  %v64_v6 = vld [vmem:[#allocation5 + $0x18] sm:$0xff]  ;;  %s535_s7 = smov [#allocation8]  }
  0x38   :  { %396 = vmatprep.subr.bf16.mxu1 %v532_v0  ;;  %369 = vmatprep.mubr.msk.f32.mxu1 %vm533_vm0, %v534_v1  ;;  %v373_v5 = vpack.c.bf16 %v62_v3, %v61_v2  ;;  %v376_v7 = vpack.c.bf16 %v64_v6, %v63_v4  ;;  %v65_v8 = vld [vmem:[#allocation5 + $0x20] sm:$0xff]  ;;  %v66_v9 = vld [vmem:[#allocation5 + $0x28] sm:$0xff]  ;;  %v157_v12 = vld [vmem:[#allocation7 + $0x10] sm:$0xff]  ;;  %s256_s8 = sshll.u32 %s535_s7, 4  ;;  %s257_s8 = int_to_ptr.vmem [resolvable:$true] %s256_s8 }
  0x39   :  { %v155_v10 = vld [vmem:[#allocation7] sm:$0xff]  ;;  %v156_v11 = vld [vmem:[#allocation7 + $0x8] sm:$0xff]  ;;  %v158_v13 = vld [vmem:[#allocation7 + $0x18] sm:$0xff]  ;;  %v379_v14 = vpack.c.bf16 %v66_v9, %v65_v8  ;;  %p504_p11 = scmp.lt.s32.totalorder %s257_s8, %s257_s8 }
  0x3a   :  { %374 = vmatpush3.bf16.msra.mxu0 %v373_v5  ;;  %v397_v15 = vpack.c.bf16 %v156_v11, %v155_v10  ;;  %v67_v16 = vld [vmem:[#allocation5 + $0x30] sm:$0xff]  ;;  %v68_v17 = vld [vmem:[#allocation5 + $0x38] sm:$0xff]  ;;  %v400_v18 = vpack.c.bf16 %v158_v13, %v157_v12  ;;  %v159_v19 = vld [vmem:[#allocation7 + $0x20] sm:$0xff] }
  0x3b   :  { %375 = vmatprep.subr.bf16.mxu0 %v532_v0  ;;  %v160_v20 = vld [vmem:[#allocation7 + $0x28] sm:$0xff]  ;;  %v382_v21 = vpack.c.bf16 %v68_v17, %v67_v16  ;;  %v69_v22 = vld [vmem:[#allocation5 + $0x40] sm:$0xff]  ;;  %v161_v25 = vld [vmem:[#allocation7 + $0x30] sm:$0xff] }
  0x3c   :  { %398 = vmatpush3.bf16.msra.mxu1 %v397_v15  ;;  %v70_v23 = vld [vmem:[#allocation5 + $0x48] sm:$0xff]  ;;  %v403_v24 = vpack.c.bf16 %v160_v20, %v159_v19  ;;  %v162_v26 = vld [vmem:[#allocation7 + $0x38] sm:$0xff]  ;;  %v71_v28 = vld [vmem:[#allocation5 + $0x50] sm:$0xff] }
  0x3d   :  { %399 = vmatprep.subr.bf16.mxu1 %v532_v0  ;;  %v385_v27 = vpack.c.bf16 %v70_v23, %v69_v22  ;;  %v72_v29 = vld [vmem:[#allocation5 + $0x58] sm:$0xff]  ;;  %v406_v30 = vpack.c.bf16 %v162_v26, %v161_v25  ;;  %v163_v31 = vld [vmem:[#allocation7 + $0x40] sm:$0xff]  ;;  %v164_v32 = vld [vmem:[#allocation7 + $0x48] sm:$0xff] }
  0x3e   :  { %377 = vmatpush3.bf16.msra.mxu0 %v376_v7  ;;  %v388_v33 = vpack.c.bf16 %v72_v29, %v71_v28  ;;  %v73_v34 = vld [vmem:[#allocation5 + $0x60] sm:$0xff]  ;;  %v74_v35 = vld [vmem:[#allocation5 + $0x68] sm:$0xff]  ;;  %v409_v36 = vpack.c.bf16 %v164_v32, %v163_v31  ;;  %v75_v38 = vld [vmem:[#allocation5 + $0x70] sm:$0xff] }
  0x3f   :  { %378 = vmatprep.subr.bf16.mxu0 %v532_v0  ;;  %v391_v37 = vpack.c.bf16 %v74_v35, %v73_v34  ;;  %v76_v39 = vld [vmem:[#allocation5 + $0x78] sm:$0xff]  ;;  %v165_v42 = vld [vmem:[#allocation7 + $0x50] sm:$0xff]  ;;  %v167_v45 = vld [vmem:[#allocation7 + $0x60] sm:$0xff] }
  0x40   :  { %401 = vmatpush3.bf16.msra.mxu1 %v400_v18  ;;  %v394_v40 = vpack.c.bf16 %v76_v39, %v75_v38  ;;  %v60_v41 = vld [vmem:[#allocation2] sm:$0xff]  ;;  %v168_v46 = vld [vmem:[#allocation7 + $0x68] sm:$0xff]  ;;  %v169_v48 = vld [vmem:[#allocation7 + $0x70] sm:$0xff] }
  0x41   :  { %402 = vmatprep.subr.bf16.mxu1 %v532_v0  ;;  %v166_v43 = vld [vmem:[#allocation7 + $0x58] sm:$0xff]  ;;  %v415_v47 = vpack.c.bf16 %v168_v46, %v167_v45 }
  0x42   :  { %380 = vmatpush3.bf16.msra.mxu0 %v379_v14  ;;  %v412_v44 = vpack.c.bf16 %v166_v43, %v165_v42  ;;  %v170_v49 = vld [vmem:[#allocation7 + $0x78] sm:$0xff] }
  0x43   :  { %381 = vmatprep.subr.bf16.mxu0 %v532_v0  ;;  %v418_v50 = vpack.c.bf16 %v170_v49, %v169_v48  ;;  %v266_v51 = vld [vmem:[%s644_s2] ss:$0 sm:$0xff]  ;;  %s499_s2 = scalar_lea.vmem %s257_s8, 128 }
  0x44   :  { %404 = vmatpush3.bf16.msra.mxu1 %v403_v24  ;;  %v267_v56 = vld [vmem:[%s646_s4] ss:$0 sm:$0xff]  ;;  %p500_p10 = scmp.ne.s32.totalorder %s257_s8, %s499_s2  ;;  %p505_p12 = scmp.lt.s32.totalorder %s499_s2, %s499_s2 }
  0x45   :  { %405 = vmatprep.subr.bf16.mxu1 %v532_v0 }
  0x46   :  { %383 = vmatpush3.bf16.msra.mxu0 %v382_v21  ;;  %p506_p13 = por %p505_p12, %p504_p11 }
  0x47   :  { %384 = vmatprep.subr.bf16.mxu0 %v532_v0 }
  0x48   :  { %407 = vmatpush3.bf16.msra.mxu1 %v406_v30  ;;  %p507_p0 = pnand %p506_p13, %p500_p10 }
  0x49   :  { %408 = vmatprep.subr.bf16.mxu1 %v532_v0 }
  0x4a   :  { %386 = vmatpush3.bf16.msra.mxu0 %v385_v27 }
  0x4b   :  { %387 = vmatprep.subr.bf16.mxu0 %v532_v0 }
  0x4c   :  { %410 = vmatpush3.bf16.msra.mxu1 %v409_v36 }
  0x4d   :  { %411 = vmatprep.subr.bf16.mxu1 %v532_v0 }
  0x4e   :  { %389 = vmatpush3.bf16.msra.mxu0 %v388_v33 }
  0x4f   :  { %390 = vmatprep.subr.bf16.mxu0 %v532_v0 }
  0x50   :  { %413 = vmatpush3.bf16.msra.mxu1 %v412_v44 }
  0x51   :  { %414 = vmatprep.subr.bf16.mxu1 %v532_v0 }
  0x52   :  { %392 = vmatpush3.bf16.msra.mxu0 %v391_v37 }
  0x53   :  { %393 = vmatprep.subr.bf16.mxu0 %v532_v0 }
  0x54   :  { %416 = vmatpush3.bf16.msra.mxu1 %v415_v47 }
  0x55   :  { %417 = vmatprep.subr.bf16.mxu1 %v532_v0 }
  0x56   :  { %395 = vmatpush3.bf16.msra.mxu0 %v394_v40 }
  0x58   :  { %419 = vmatpush3.bf16.msra.mxu1 %v418_v50 }
  0x59   :  { %335 = vmatmul.mubr.f32.vlgmr.msra.gmra.mrb[0].mxu0 %v60_v41 }
 0x12c   :  { %v150_v52 = vpop.f32.mrb[0].mxu0 }
 0x12d   :  { %v151_v53 = vadd.f32 %v266_v51, %v150_v52  ;;  %v336_v54 = vpop.f32.mrb[1].mxu0 }
 0x12f   :  { %429 = vtanh.f32 %v151_v53 }
 0x139   :  { %v430_v55 = vpop.eup %429 }
 0x13a   :  { %370 = vmatmul.mubr.f32.vlgmr.msra.gmra.mrb[0].mxu1 %v430_v55 }
 0x20d   :  { %v244_v57 = vpop.f32.mrb[0].mxu1 }
 0x20e   :  { %v245_v58 = vadd.f32 %v267_v56, %v244_v57  ;;  %v371_v59 = vpop.f32.mrb[1].mxu1 }
 0x210   :  { %431 = vtanh.f32 %v245_v58 }
 0x21a   :  { %v432_v60 = vpop.eup %431 }
 0x21b   :  { %249 = vst [vmem:[#allocation8] sm:$0xff] %v432_v60 }
 0x21c   :  { %510 = shalt.err (!%p507_p0)
}
 0x21d   :  { %s511_s4 = scalar_lea.hbm %s647_s5, 128 }
 0x21e   :  { %p512_p1 = scmp.ne.s32.totalorder %s647_s5, %s511_s4  ;;  %p515_p2 = scmp.lt.u32.totalorder %s511_s4, %s647_s5 }
 0x220   :  { %p517_p3 = pnand %p515_p2, %p512_p1 }
 0x222   :  { %520 = shalt.err (!%p517_p3)
}
 0x223   :  { %259 = dma.vmem_to_hbm [thread:$0]  %s257_s8, 128, %s647_s5, [#allocation4]  }
 0x224   :  { %525 = dma.done.wait [#allocation4], 128  }
 0x225   :  { %526 = vsyncadd [#allocation4], 4294967168 }
 0x226   :  { %263 = vsyncpa [#allocation3], 1 }
 0x227   :  { %264 = vsyncpa [#allocation6], 1 }
 0x228   :  { %265 = vsyncpa [#allocation4], 1 }

</bundles_post_ra>
